<compile_context>
chip_gen: v6e
topology: v6e:2x2x1
jax: 0.10.0
libtpu: 0.0.40
codegen_flags: <defaults>
</compile_context>

<pallas_src>
import functools

import jax
import jax.numpy as jnp
from jax.experimental import pallas as pl
from jax.experimental.pallas import tpu as pltpu


def _round_up(x, m):
    return (x + m - 1) // m * m


def club_kernel(x_ref, y_ref, ym_ref, y2m_ref,
                w1_ref, b1_ref, w2_ref, b2_ref, w3_ref, b3_ref,
                out_ref, *, n_valid, tile_rows, y_dim):
    x = x_ref[...].astype(jnp.float32)          # [T, x_dim]
    y = y_ref[...].astype(jnp.float32)          # [T, y_dim]

    # Fused p_mu / p_logvar MLP (block-diagonal, zero-padded weights).
    h = jnp.dot(x, w1_ref[...], preferred_element_type=jnp.float32) + b1_ref[...]
    h = jnp.maximum(h, 0.0)
    h = jnp.dot(h, w2_ref[...], preferred_element_type=jnp.float32) + b2_ref[...]
    h = jnp.maximum(h, 0.0)
    o3 = jnp.dot(h, w3_ref[...], preferred_element_type=jnp.float32) + b3_ref[...]

    mu = o3[:, :y_dim]                           # [T, y_dim]
    logvar = jnp.tanh(o3[:, y_dim:2 * y_dim])    # [T, y_dim]
    inv_var = jnp.exp(-logvar)                   # 1 / exp(logvar)

    y_mean = ym_ref[...]                         # [1, y_dim]  (full-y moments)
    y2_mean = y2m_ref[...]                       # [1, y_dim]
    # mean_j (y_j - mu_i)^2 = E[y^2] - 2*mu_i*E[y] + mu_i^2   (per feature)
    neg_sq = y2_mean - 2.0 * mu * y_mean + mu * mu

    # positive - negative = 0.5 * inv_var * (neg_sq - (mu - y)^2)
    contrib = 0.5 * inv_var * (neg_sq - (mu - y) ** 2)       # [T, y_dim]

    # Mask zero-padded rows beyond the true sample count.
    row = (pl.program_id(0) * tile_rows
           + jax.lax.broadcasted_iota(jnp.int32, contrib.shape, 0))
    contrib = jnp.where(row < n_valid, contrib, 0.0)

    part = jnp.sum(contrib, axis=1, keepdims=True)           # [T, 1]
    part = jnp.sum(part, axis=0, keepdims=True)              # [1, 1]
    # Lane-dense, unmasked (8,128) partial-sum block; wrapper reads [0, 0].
    out_ref[...] = jnp.broadcast_to(part, (8, 128))


def club_forward(x_samples, y_samples, params, *, tile_rows=1024):
    """Pallas-backed CLUB.forward; returns a scalar (mean MI upper bound)."""
    n, x_dim = x_samples.shape
    _, y_dim = y_samples.shape
    (w1m, b1m, w2m, b2m, w3m, b3m, w1v, b1v, w2v, b2v, w3v, b3v) = params
    hidden = w1m.shape[1]
    f32 = jnp.float32

    # --- fused / zero-padded weights (built at JAX level, not in-kernel) ---
    hp = max(128, _round_up(2 * hidden, 128))   # fused hidden width (lane-dense)
    op = max(128, _round_up(2 * y_dim, 128))    # fused output width (lane-dense)
    w1 = (jnp.zeros((x_dim, hp), f32)
          .at[:, :hidden].set(w1m).at[:, hidden:2 * hidden].set(w1v))
    b1 = (jnp.zeros((1, hp), f32)
          .at[:, :hidden].set(b1m).at[:, hidden:2 * hidden].set(b1v))
    w2 = (jnp.zeros((hp, hp), f32)
          .at[:hidden, :hidden].set(w2m)
          .at[hidden:2 * hidden, hidden:2 * hidden].set(w2v))
    b2 = (jnp.zeros((1, hp), f32)
          .at[:, :hidden].set(b2m).at[:, hidden:2 * hidden].set(b2v))
    w3 = (jnp.zeros((hp, op), f32)
          .at[:hidden, :y_dim].set(w3m)
          .at[hidden:2 * hidden, y_dim:2 * y_dim].set(w3v))
    b3 = (jnp.zeros((1, op), f32)
          .at[:, :y_dim].set(b3m).at[:, y_dim:2 * y_dim].set(b3v))

    # --- y moments over the FULL sample set (cross-tile dependency hoisted) ---
    yf = y_samples.astype(f32)
    y_mean = jnp.mean(yf, axis=0, keepdims=True)             # [1, y_dim]
    y2_mean = jnp.mean(yf * yf, axis=0, keepdims=True)       # [1, y_dim]

    # --- row tiling over N (multiples of 8 sublanes; ragged N padded+masked) ---
    tile = max(8, min(_round_up(tile_rows, 8), _round_up(n, 8)))
    n_pad = _round_up(n, tile)
    x, y = x_samples, y_samples
    if n_pad != n:
        x = jnp.pad(x, ((0, n_pad - n), (0, 0)))
        y = jnp.pad(y, ((0, n_pad - n), (0, 0)))
    num_tiles = n_pad // tile

    kernel = functools.partial(club_kernel, n_valid=n, tile_rows=tile, y_dim=y_dim)
    const = lambda i: (0, 0)
    partials = pl.pallas_call(
        kernel,
        grid=(num_tiles,),
        out_shape=jax.ShapeDtypeStruct((num_tiles * 8, 128), jnp.float32),
        in_specs=[
            pl.BlockSpec((tile, x_dim), lambda i: (i, 0)),   # x row tile
            pl.BlockSpec((tile, y_dim), lambda i: (i, 0)),   # y row tile
            pl.BlockSpec((1, y_dim), const),                 # E[y]
            pl.BlockSpec((1, y_dim), const),                 # E[y^2]
            pl.BlockSpec((x_dim, hp), const),                # fused W1
            pl.BlockSpec((1, hp), const),                    # fused b1
            pl.BlockSpec((hp, hp), const),                   # fused W2
            pl.BlockSpec((1, hp), const),                    # fused b2
            pl.BlockSpec((hp, op), const),                   # fused W3
            pl.BlockSpec((1, op), const),                    # fused b3
        ],
        out_specs=pl.BlockSpec((8, 128), lambda i: (i, 0)),
        compiler_params=pltpu.CompilerParams(
            dimension_semantics=("parallel",)),
    )(x, y, y_mean, y2_mean, w1, b1, w2, b2, w3, b3)

    return jnp.sum(partials[0::8, 0]) / n


def init_params(key, x_dim, y_dim, hidden):
    """Deterministic parameter init; weights stored as (in_dim, out_dim)."""
    ks = jax.random.split(key, 12)

    def lin(kw, kb, din, dout):
        bound = 1.0 / jnp.sqrt(din)
        w = jax.random.uniform(kw, (din, dout), jnp.float32, -bound, bound)
        b = jax.random.uniform(kb, (1, dout), jnp.float32, -bound, bound)
        return w, b

    w1m, b1m = lin(ks[0], ks[1], x_dim, hidden)
    w2m, b2m = lin(ks[2], ks[3], hidden, hidden)
    w3m, b3m = lin(ks[4], ks[5], hidden, y_dim)
    w1v, b1v = lin(ks[6], ks[7], x_dim, hidden)
    w2v, b2v = lin(ks[8], ks[9], hidden, hidden)
    w3v, b3v = lin(ks[10], ks[11], hidden, y_dim)
    return (w1m, b1m, w2m, b2m, w3m, b3m, w1v, b1v, w2v, b2v, w3v, b3v)


def club_reference(x, y, params):
    """Pure-JAX reference mirroring the PyTorch forward literally."""
    (w1m, b1m, w2m, b2m, w3m, b3m, w1v, b1v, w2v, b2v, w3v, b3v) = params

    def mlp(x, w1, b1, w2, b2, w3, b3):
        h = jnp.maximum(x @ w1 + b1, 0.0)
        h = jnp.maximum(h @ w2 + b2, 0.0)
        return h @ w3 + b3

    mu = mlp(x, w1m, b1m, w2m, b2m, w3m, b3m)
    logvar = jnp.tanh(mlp(x, w1v, b1v, w2v, b2v, w3v, b3v))
    positive = -(mu - y) ** 2 / 2.0 / jnp.exp(logvar)
    diff = y[None, :, :] - mu[:, None, :]
    negative = -jnp.mean(diff ** 2, axis=1) / 2.0 / jnp.exp(logvar)
    return jnp.mean(positive.sum(-1) - negative.sum(-1))


if __name__ == "__main__":
    N, X_DIM, Y_DIM, HIDDEN = 8, 32, 32, 32

    key = jax.random.PRNGKey(0)
    kx, ky, kp = jax.random.split(key, 3)
    x = jax.random.normal(kx, (N, X_DIM), jnp.float32)
    y = jax.random.normal(ky, (N, Y_DIM), jnp.float32)
    params = init_params(kp, X_DIM, Y_DIM, HIDDEN)

    result = club_forward(x, y, params)
    jax.block_until_ready(result)

    ref = club_reference(x, y, params)
    assert jnp.allclose(result, ref, rtol=1e-4, atol=1e-4), (result, ref)

    print("KERNEL_OK")
</pallas_src>

<mosaic_0001>
module attributes {stable_mosaic.version = 11 : i64} {
  func.func @club_kernel(%arg0: i32, %arg1: memref<8x32xf32, #tpu.memory_space<vmem>>, %arg2: memref<8x32xf32, #tpu.memory_space<vmem>>, %arg3: memref<1x32xf32, #tpu.memory_space<vmem>>, %arg4: memref<1x32xf32, #tpu.memory_space<vmem>>, %arg5: memref<32x128xf32, #tpu.memory_space<vmem>>, %arg6: memref<1x128xf32, #tpu.memory_space<vmem>>, %arg7: memref<128x128xf32, #tpu.memory_space<vmem>>, %arg8: memref<1x128xf32, #tpu.memory_space<vmem>>, %arg9: memref<128x128xf32, #tpu.memory_space<vmem>>, %arg10: memref<1x128xf32, #tpu.memory_space<vmem>>, %arg11: memref<8x128xf32, #tpu.memory_space<vmem>>) attributes {dimension_semantics = [#tpu.dimension_semantics<parallel>], iteration_bounds = array<i64: 1>, scalar_prefetch = 0 : i64, scratch_operands = 0 : i64, tpu.core_type = #tpu.core_type<tc>, window_params = [{transform_indices = @transform_0, window_bounds = array<i64: 8, 32>}, {transform_indices = @transform_1, window_bounds = array<i64: 8, 32>}, {pipeline_mode = #tpu.pipeline_mode<synchronous>, transform_indices = @transform_2, window_bounds = array<i64: 1, 32>}, {pipeline_mode = #tpu.pipeline_mode<synchronous>, transform_indices = @transform_3, window_bounds = array<i64: 1, 32>}, {pipeline_mode = #tpu.pipeline_mode<synchronous>, transform_indices = @transform_4, window_bounds = array<i64: 32, 128>}, {pipeline_mode = #tpu.pipeline_mode<synchronous>, transform_indices = @transform_5, window_bounds = array<i64: 1, 128>}, {pipeline_mode = #tpu.pipeline_mode<synchronous>, transform_indices = @transform_6, window_bounds = array<i64: 128, 128>}, {pipeline_mode = #tpu.pipeline_mode<synchronous>, transform_indices = @transform_7, window_bounds = array<i64: 1, 128>}, {pipeline_mode = #tpu.pipeline_mode<synchronous>, transform_indices = @transform_8, window_bounds = array<i64: 128, 128>}, {pipeline_mode = #tpu.pipeline_mode<synchronous>, transform_indices = @transform_9, window_bounds = array<i64: 1, 128>}, {transform_indices = @transform_10, window_bounds = array<i64: 8, 128>}]} {
    %c0 = arith.constant 0 : index
    %c0_0 = arith.constant 0 : index
    %0 = vector.load %arg1[%c0, %c0_0] : memref<8x32xf32, #tpu.memory_space<vmem>>, vector<8x32xf32>
    %c0_1 = arith.constant 0 : index
    %c0_2 = arith.constant 0 : index
    %1 = vector.load %arg2[%c0_1, %c0_2] : memref<8x32xf32, #tpu.memory_space<vmem>>, vector<8x32xf32>
    %c0_3 = arith.constant 0 : index
    %c0_4 = arith.constant 0 : index
    %2 = vector.load %arg5[%c0_3, %c0_4] : memref<32x128xf32, #tpu.memory_space<vmem>>, vector<32x128xf32>
    %cst = arith.constant dense<0.000000e+00> : vector<8x128xf32>
    %3 = tpu.matmul %0, %2, %cst {dimension_numbers = #tpu.dot_dimension_numbers<[1], [0], [0], [1], [0, 0, 1, 1], [], []>} : vector<8x32xf32>, vector<32x128xf32>, vector<8x128xf32> -> vector<8x128xf32>
    %c0_5 = arith.constant 0 : index
    %c0_6 = arith.constant 0 : index
    %4 = vector.load %arg6[%c0_5, %c0_6] : memref<1x128xf32, #tpu.memory_space<vmem>>, vector<1x128xf32>
    %5 = vector.broadcast %4 : vector<1x128xf32> to vector<8x128xf32>
    %6 = arith.addf %3, %5 : vector<8x128xf32>
    %cst_7 = arith.constant 0.000000e+00 : f32
    %7 = vector.broadcast %cst_7 : f32 to vector<8x128xf32>
    %8 = arith.maximumf %6, %7 : vector<8x128xf32>
    %c0_8 = arith.constant 0 : index
    %c0_9 = arith.constant 0 : index
    %9 = vector.load %arg7[%c0_8, %c0_9] : memref<128x128xf32, #tpu.memory_space<vmem>>, vector<128x128xf32>
    %cst_10 = arith.constant dense<0.000000e+00> : vector<8x128xf32>
    %10 = tpu.matmul %8, %9, %cst_10 {dimension_numbers = #tpu.dot_dimension_numbers<[1], [0], [0], [1], [0, 0, 1, 1], [], []>} : vector<8x128xf32>, vector<128x128xf32>, vector<8x128xf32> -> vector<8x128xf32>
    %c0_11 = arith.constant 0 : index
    %c0_12 = arith.constant 0 : index
    %11 = vector.load %arg8[%c0_11, %c0_12] : memref<1x128xf32, #tpu.memory_space<vmem>>, vector<1x128xf32>
    %12 = vector.broadcast %11 : vector<1x128xf32> to vector<8x128xf32>
    %13 = arith.addf %10, %12 : vector<8x128xf32>
    %cst_13 = arith.constant 0.000000e+00 : f32
    %14 = vector.broadcast %cst_13 : f32 to vector<8x128xf32>
    %15 = arith.maximumf %13, %14 : vector<8x128xf32>
    %c0_14 = arith.constant 0 : index
    %c0_15 = arith.constant 0 : index
    %16 = vector.load %arg9[%c0_14, %c0_15] : memref<128x128xf32, #tpu.memory_space<vmem>>, vector<128x128xf32>
    %cst_16 = arith.constant dense<0.000000e+00> : vector<8x128xf32>
    %17 = tpu.matmul %15, %16, %cst_16 {dimension_numbers = #tpu.dot_dimension_numbers<[1], [0], [0], [1], [0, 0, 1, 1], [], []>} : vector<8x128xf32>, vector<128x128xf32>, vector<8x128xf32> -> vector<8x128xf32>
    %c0_17 = arith.constant 0 : index
    %c0_18 = arith.constant 0 : index
    %18 = vector.load %arg10[%c0_17, %c0_18] : memref<1x128xf32, #tpu.memory_space<vmem>>, vector<1x128xf32>
    %19 = vector.broadcast %18 : vector<1x128xf32> to vector<8x128xf32>
    %20 = arith.addf %17, %19 : vector<8x128xf32>
    %21 = vector.extract_strided_slice %20 {offsets = [0, 0], sizes = [8, 32], strides = [1, 1]} : vector<8x128xf32> to vector<8x32xf32>
    %22 = vector.extract_strided_slice %20 {offsets = [0, 32], sizes = [8, 32], strides = [1, 1]} : vector<8x128xf32> to vector<8x32xf32>
    %23 = math.tanh %22 : vector<8x32xf32>
    %cst_19 = arith.constant 0.000000e+00 : f32
    %24 = vector.broadcast %cst_19 : f32 to vector<8x32xf32>
    %25 = arith.subf %24, %23 : vector<8x32xf32>
    %26 = math.exp %25 : vector<8x32xf32>
    %c0_20 = arith.constant 0 : index
    %c0_21 = arith.constant 0 : index
    %27 = vector.load %arg3[%c0_20, %c0_21] : memref<1x32xf32, #tpu.memory_space<vmem>>, vector<1x32xf32>
    %c0_22 = arith.constant 0 : index
    %c0_23 = arith.constant 0 : index
    %28 = vector.load %arg4[%c0_22, %c0_23] : memref<1x32xf32, #tpu.memory_space<vmem>>, vector<1x32xf32>
    %cst_24 = arith.constant 2.000000e+00 : f32
    %29 = vector.broadcast %cst_24 : f32 to vector<8x32xf32>
    %30 = arith.mulf %29, %21 : vector<8x32xf32>
    %31 = vector.broadcast %27 : vector<1x32xf32> to vector<8x32xf32>
    %32 = arith.mulf %30, %31 : vector<8x32xf32>
    %33 = vector.broadcast %28 : vector<1x32xf32> to vector<8x32xf32>
    %34 = arith.subf %33, %32 : vector<8x32xf32>
    %35 = arith.mulf %21, %21 : vector<8x32xf32>
    %36 = arith.addf %34, %35 : vector<8x32xf32>
    %cst_25 = arith.constant 5.000000e-01 : f32
    %37 = vector.broadcast %cst_25 : f32 to vector<8x32xf32>
    %38 = arith.mulf %37, %26 : vector<8x32xf32>
    %39 = arith.subf %21, %1 : vector<8x32xf32>
    %40 = arith.mulf %39, %39 : vector<8x32xf32>
    %41 = arith.subf %36, %40 : vector<8x32xf32>
    %42 = arith.mulf %38, %41 : vector<8x32xf32>
    %c8_i32 = arith.constant 8 : i32
    %43 = arith.muli %arg0, %c8_i32 : i32
    %44 = tpu.iota {dimensions = array<i32: 0>} : vector<8x32xi32>
    %45 = vector.broadcast %43 : i32 to vector<8x32xi32>
    %46 = arith.addi %45, %44 : vector<8x32xi32>
    %c8_i32_26 = arith.constant 8 : i32
    %47 = vector.broadcast %c8_i32_26 : i32 to vector<8x32xi32>
    %48 = arith.cmpi slt, %46, %47 : vector<8x32xi32>
    %cst_27 = arith.constant 0.000000e+00 : f32
    %49 = vector.broadcast %cst_27 : f32 to vector<8x32xf32>
    %50 = arith.select %48, %42, %49 : vector<8x32xi1>, vector<8x32xf32>
    %cst_28 = arith.constant dense<0.000000e+00> : vector<8xf32>
    %51 = vector.multi_reduction <add>, %50, %cst_28 [1] : vector<8x32xf32> to vector<8xf32>
    %52 = vector.shape_cast %51 : vector<8xf32> to vector<8x1xf32>
    %cst_29 = arith.constant dense<0.000000e+00> : vector<1xf32>
    %53 = vector.multi_reduction <add>, %52, %cst_29 [0] : vector<8x1xf32> to vector<1xf32>
    %54 = vector.shape_cast %53 : vector<1xf32> to vector<1x1xf32>
    %55 = vector.shape_cast %54 : vector<1x1xf32> to vector<1x1xf32>
    %56 = vector.broadcast %55 : vector<1x1xf32> to vector<8x128xf32>
    %c0_30 = arith.constant 0 : index
    %c0_31 = arith.constant 0 : index
    %57 = vector.load %arg11[%c0_30, %c0_31] : memref<8x128xf32, #tpu.memory_space<vmem>>, vector<8x128xf32>
    tpu.vector_store %arg11[%c0_30, %c0_31], %56 {strides = array<i32>} : memref<8x128xf32, #tpu.memory_space<vmem>>, vector<8x128xf32>,
    return
  }
  func.func @transform_0(%arg0: i32) -> (i32, i32) {
    %c0_i32 = arith.constant 0 : i32
    %c0_i32_0 = arith.constant 0 : i32
    return %arg0, %c0_i32 : i32, i32
  }
  func.func @transform_1(%arg0: i32) -> (i32, i32) {
    %c0_i32 = arith.constant 0 : i32
    %c0_i32_0 = arith.constant 0 : i32
    return %arg0, %c0_i32 : i32, i32
  }
  func.func @transform_2(%arg0: i32) -> (i32, i32) {
    %c0_i32 = arith.constant 0 : i32
    %c0_i32_0 = arith.constant 0 : i32
    %c0_i32_1 = arith.constant 0 : i32
    return %c0_i32, %c0_i32_0 : i32, i32
  }
  func.func @transform_3(%arg0: i32) -> (i32, i32) {
    %c0_i32 = arith.constant 0 : i32
    %c0_i32_0 = arith.constant 0 : i32
    %c0_i32_1 = arith.constant 0 : i32
    return %c0_i32, %c0_i32_0 : i32, i32
  }
  func.func @transform_4(%arg0: i32) -> (i32, i32) {
    %c0_i32 = arith.constant 0 : i32
    %c0_i32_0 = arith.constant 0 : i32
    %c0_i32_1 = arith.constant 0 : i32
    return %c0_i32, %c0_i32_0 : i32, i32
  }
  func.func @transform_5(%arg0: i32) -> (i32, i32) {
    %c0_i32 = arith.constant 0 : i32
    %c0_i32_0 = arith.constant 0 : i32
    %c0_i32_1 = arith.constant 0 : i32
    return %c0_i32, %c0_i32_0 : i32, i32
  }
  func.func @transform_6(%arg0: i32) -> (i32, i32) {
    %c0_i32 = arith.constant 0 : i32
    %c0_i32_0 = arith.constant 0 : i32
    %c0_i32_1 = arith.constant 0 : i32
    return %c0_i32, %c0_i32_0 : i32, i32
  }
  func.func @transform_7(%arg0: i32) -> (i32, i32) {
    %c0_i32 = arith.constant 0 : i32
    %c0_i32_0 = arith.constant 0 : i32
    %c0_i32_1 = arith.constant 0 : i32
    return %c0_i32, %c0_i32_0 : i32, i32
  }
  func.func @transform_8(%arg0: i32) -> (i32, i32) {
    %c0_i32 = arith.constant 0 : i32
    %c0_i32_0 = arith.constant 0 : i32
    %c0_i32_1 = arith.constant 0 : i32
    return %c0_i32, %c0_i32_0 : i32, i32
  }
  func.func @transform_9(%arg0: i32) -> (i32, i32) {
    %c0_i32 = arith.constant 0 : i32
    %c0_i32_0 = arith.constant 0 : i32
    %c0_i32_1 = arith.constant 0 : i32
    return %c0_i32, %c0_i32_0 : i32, i32
  }
  func.func @transform_10(%arg0: i32) -> (i32, i32) {
    %c0_i32 = arith.constant 0 : i32
    %c0_i32_0 = arith.constant 0 : i32
    return %arg0, %c0_i32 : i32, i32
  }
}

</mosaic_0001>

<bundles_post_ra>
// kernel: tpu_custom_call.1
= control target key start
LH: loop header
LB: loop body
LE: loop exit
PB: predicated region body
PF: predicated region fallthrough
CT: control target
= control target key end

     0   :  { %15 = vsyncpa [#allocation3], 0  ;;  %s868_s0 = inlined_call_operand.hbm [shape: f32[8,32], index: 0, kind: input, shape index: {}]   ;;  %s869_s1 = inlined_call_operand.hbm [shape: f32[8,32], index: 1, kind: input, shape index: {}]   ;;  %s870_s2 = inlined_call_operand.vmem [shape: f32[1,32], index: 2, kind: input, shape index: {}]   ;;  %s871_s3 = inlined_call_operand.vmem [shape: f32[1,32], index: 3, kind: input, shape index: {}]   ;;  %s872_s4 = inlined_call_operand.hbm [shape: f32[32,128], index: 4, kind: input, shape index: {}]   ;;  %s873_s5 = inlined_call_operand.vmem [shape: f32[1,128], index: 5, kind: input, shape index: {}]   ;;  %s874_s6 = inlined_call_operand.hbm [shape: f32[128,128], index: 6, kind: input, shape index: {}]   ;;  %s875_s7 = inlined_call_operand.vmem [shape: f32[1,128], index: 7, kind: input, shape index: {}]   ;;  %s876_s8 = inlined_call_operand.hbm [shape: f32[128,128], index: 8, kind: input, shape index: {}]   ;;  %s877_s9 = inlined_call_operand.vmem [shape: f32[1,128], index: 9, kind: input, shape index: {}]   ;;  %s878_s10 = inlined_call_operand.hbm [shape: f32[8,128], index: 10, kind: output, shape index: {}]  }
   0x1   :  { %16 = vsyncpa [#allocation6], 0 }
   0x2   :  { %17 = vsyncpa [#allocation9], 0 }
   0x3   :  { %18 = vsyncpa [#allocation4], 0  ;;  %s715_s13 = smov [#allocation5]  }
   0x4   :  { %s35_s14 = sshll.u32 %s715_s13, 4  ;;  %s36_s14 = int_to_ptr.vmem [resolvable:$true] %s35_s14 }
   0x5   :  { %s595_s15 = scalar_lea.vmem %s36_s14, 128  ;;  %p600_p1 = scmp.lt.s32.totalorder %s36_s14, %s36_s14 }
   0x6   :  { %p596_p0 = scmp.ne.s32.totalorder %s36_s14, %s595_s15  ;;  %p601_p2 = scmp.lt.s32.totalorder %s595_s15, %s595_s15 }
   0x8   :  { %p602_p3 = por %p601_p2, %p600_p1 }
   0xa   :  { %p603_p4 = pnand %p602_p3, %p596_p0 }
   0xc   :  { %606 = shalt.err (!%p603_p4)
}
   0xd   :  { %38 = dma.hbm_to_vmem [thread:$0]  %s869_s1, 128, %s36_s14, [#allocation6]  }
   0xe   :  { %s716_s18 = smov [#allocation8]   ;;  %s717_s20 = smov [#allocation2]  }
   0xf   :  { %s62_s19 = sshll.u32 %s716_s18, 4  ;;  %s25_s21 = sshll.u32 %s717_s20, 4  ;;  %s63_s19 = int_to_ptr.vmem [resolvable:$true] %s62_s19  ;;  %s26_s21 = int_to_ptr.vmem [resolvable:$true] %s25_s21 }
  0x10   :  { %s615_s22 = scalar_lea.vmem %s63_s19, 2048  ;;  %p620_p6 = scmp.lt.s32.totalorder %s63_s19, %s63_s19 }
  0x11   :  { %p616_p5 = scmp.ne.s32.totalorder %s63_s19, %s615_s22  ;;  %p621_p7 = scmp.lt.s32.totalorder %s615_s22, %s615_s22 }
  0x13   :  { %p622_p8 = por %p621_p7, %p620_p6 }
  0x15   :  { %p623_p9 = pnand %p622_p8, %p616_p5 }
  0x17   :  { %626 = shalt.err (!%p623_p9)
}
  0x18   :  { %s718_s23 = smov 128   ;;  %s719_s24 = smov 8  }
  0x19   :  { %68 = dma.hbm_to_vmem [thread:$0]  %s874_s6, 2048, %s63_s19, [#allocation9], %s718_s23, %s718_s23, %s719_s24  }
  0x1a   :  { %s635_s1 = scalar_lea.vmem %s26_s21, 128  ;;  %p640_p11 = scmp.lt.s32.totalorder %s26_s21, %s26_s21 }
  0x1b   :  { %p636_p10 = scmp.ne.s32.totalorder %s26_s21, %s635_s1  ;;  %p641_p12 = scmp.lt.s32.totalorder %s635_s1, %s635_s1 }
  0x1d   :  { %p642_p13 = por %p641_p12, %p640_p11 }
  0x1f   :  { %p643_p0 = pnand %p642_p13, %p636_p10 }
  0x21   :  { %646 = shalt.err (!%p643_p0)
}
  0x22   :  { %28 = dma.hbm_to_vmem [thread:$0]  %s868_s0, 128, %s26_s21, [#allocation3]  }
  0x23   :  { %s720_s29 = smov [#allocation7]   ;;  %s721_s11 = smov [#allocation10]  }
  0x24   :  { %s48_s30 = sshll.u32 %s720_s29, 4  ;;  %s76_s12 = sshll.u32 %s721_s11, 4  ;;  %s49_s30 = int_to_ptr.vmem [resolvable:$true] %s48_s30  ;;  %s77_s12 = int_to_ptr.vmem [resolvable:$true] %s76_s12 }
  0x25   :  { %s655_s13 = scalar_lea.vmem %s49_s30, 512  ;;  %p660_p2 = scmp.lt.s32.totalorder %s49_s30, %s49_s30 }
  0x26   :  { %p656_p1 = scmp.ne.s32.totalorder %s49_s30, %s655_s13  ;;  %p661_p3 = scmp.lt.s32.totalorder %s655_s13, %s655_s13 }
  0x28   :  { %p662_p4 = por %p661_p3, %p660_p2 }
  0x2a   :  { %p663_p5 = pnand %p662_p4, %p656_p1 }
  0x2c   :  { %666 = shalt.err (!%p663_p5)
}
  0x2d   :  { %54 = dma.hbm_to_vmem [thread:$0]  %s872_s4, 512, %s49_s30, [#allocation6], %s718_s23, %s718_s23, %s719_s24  }
  0x2e   :  { %s675_s0 = scalar_lea.vmem %s77_s12, 2048  ;;  %p680_p7 = scmp.lt.s32.totalorder %s77_s12, %s77_s12 }
  0x2f   :  { %p676_p6 = scmp.ne.s32.totalorder %s77_s12, %s675_s0  ;;  %p681_p8 = scmp.lt.s32.totalorder %s675_s0, %s675_s0 }
  0x31   :  { %p682_p9 = por %p681_p8, %p680_p7 }
  0x33   :  { %p683_p10 = pnand %p682_p9, %p676_p6 }
  0x35   :  { %686 = shalt.err (!%p683_p10)
}
  0x36   :  { %82 = dma.hbm_to_vmem [thread:$0]  %s876_s8, 2048, %s77_s12, [#allocation9], %s718_s23, %s718_s23, %s719_s24  }
  0x37   :  { %707 = dma.done.wait [#allocation3], 128  }
  0x38   :  { %708 = vsyncadd [#allocation3], 4294967168 }
  0x39   :  { %709 = dma.done.wait [#allocation6], 640  }
  0x3a   :  { %710 = vsyncadd [#allocation6], 4294966656 }
  0x3b   :  { %711 = dma.done.wait [#allocation9], 4096  }
  0x3c   :  { %712 = vsyncadd [#allocation9], 4294963200  ;;  %v722_v0 = vmov 0.0   ;;  %vm723_vm0 = vmmov 0   ;;  %v105_v1 = vld [vmem:[#allocation7 + $0x18] sm:$0xff]  ;;  %v104_v2 = vld [vmem:[#allocation7 + $0x10] sm:$0xff] }
  0x3d   :  { %490 = vmatprep.subr.mxu0 %v722_v0  ;;  %498 = vmatprep.mubr.msk.f32.mxu0 %vm723_vm0, %v722_v0  ;;  %v203_v3 = vld [vmem:[#allocation8 + $0x78] sm:$0xff]  ;;  %v103_v4 = vld [vmem:[#allocation7 + $0x8] sm:$0xff]  ;;  %v202_v5 = vld [vmem:[#allocation8 + $0x70] sm:$0xff]  ;;  %vm113_vm1 = vcmask 261120  }
  0x3e   :  { %501 = vmatprep.subr.mxu1 %v722_v0  ;;  %533 = vmatprep.mubr.msk.f32.mxu1 %vm723_vm0, %v722_v0  ;;  %v201_v6 = vld [vmem:[#allocation8 + $0x68] sm:$0xff]  ;;  %v102_v7 = vld [vmem:[#allocation7] sm:$0xff]  ;;  %v100_v8 = vld [vmem:[#allocation2] sm:$0xff] }
  0x3f   :  { %491 = vmatpush3.msra.mxu0 %v105_v1  ;;  %502 = vmatpush3.msra.mxu1 %v203_v3  ;;  %v200_v9 = vld [vmem:[#allocation8 + $0x60] sm:$0xff]  ;;  %v199_v10 = vld [vmem:[#allocation8 + $0x58] sm:$0xff]  ;;  %v198_v11 = vld [vmem:[#allocation8 + $0x50] sm:$0xff] }
  0x40   :  { %492 = vmatprep.subr.mxu0 %v722_v0  ;;  %503 = vmatprep.subr.mxu1 %v722_v0  ;;  %v197_v12 = vld [vmem:[#allocation8 + $0x48] sm:$0xff]  ;;  %v196_v13 = vld [vmem:[#allocation8 + $0x40] sm:$0xff]  ;;  %v195_v14 = vld [vmem:[#allocation8 + $0x38] sm:$0xff] }
  0x41   :  { %493 = vmatpush3.msra.mxu0 %v104_v2  ;;  %504 = vmatpush3.msra.mxu1 %v202_v5  ;;  %v194_v15 = vld [vmem:[#allocation8 + $0x30] sm:$0xff]  ;;  %v193_v16 = vld [vmem:[#allocation8 + $0x28] sm:$0xff]  ;;  %v192_v17 = vld [vmem:[#allocation8 + $0x20] sm:$0xff] }
  0x42   :  { %494 = vmatprep.subr.mxu0 %v722_v0  ;;  %505 = vmatprep.subr.mxu1 %v722_v0  ;;  %v191_v18 = vld [vmem:[#allocation8 + $0x18] sm:$0xff]  ;;  %v190_v19 = vld [vmem:[#allocation8 + $0x10] sm:$0xff]  ;;  %v189_v20 = vld [vmem:[#allocation8 + $0x8] sm:$0xff] }
  0x43   :  { %495 = vmatpush3.msra.mxu0 %v103_v4  ;;  %506 = vmatpush3.msra.mxu1 %v201_v6  ;;  %v188_v21 = vld [vmem:[#allocation8] sm:$0xff]  ;;  %v297_v22 = vld [vmem:[#allocation10 + $0x78] sm:$0xff]  ;;  %v296_v23 = vld [vmem:[#allocation10 + $0x70] sm:$0xff] }
  0x44   :  { %496 = vmatprep.subr.mxu0 %v722_v0  ;;  %507 = vmatprep.subr.mxu1 %v722_v0  ;;  %v295_v24 = vld [vmem:[#allocation10 + $0x68] sm:$0xff]  ;;  %v294_v25 = vld [vmem:[#allocation10 + $0x60] sm:$0xff]  ;;  %v293_v26 = vld [vmem:[#allocation10 + $0x58] sm:$0xff] }
  0x45   :  { %497 = vmatpush3.msra.mxu0 %v102_v7  ;;  %508 = vmatpush3.msra.mxu1 %v200_v9  ;;  %v292_v27 = vld [vmem:[#allocation10 + $0x50] sm:$0xff]  ;;  %v291_v28 = vld [vmem:[#allocation10 + $0x48] sm:$0xff]  ;;  %v290_v29 = vld [vmem:[#allocation10 + $0x40] sm:$0xff] }
  0x46   :  { %499 = vmatmul.mubr.msk.f32.vlgmr.msra.gmra.mxu0 %vm113_vm1, %v100_v8  ;;  %509 = vmatprep.subr.mxu1 %v722_v0  ;;  %v289_v30 = vld [vmem:[#allocation10 + $0x38] sm:$0xff]  ;;  %v288_v31 = vld [vmem:[#allocation10 + $0x30] sm:$0xff]  ;;  %v287_v32 = vld [vmem:[#allocation10 + $0x28] sm:$0xff] }
  0x47   :  { %536 = vmatprep.subr.mxu0 %v722_v0  ;;  %510 = vmatpush3.msra.mxu1 %v199_v10  ;;  %v286_v33 = vld [vmem:[#allocation10 + $0x20] sm:$0xff]  ;;  %v285_v34 = vld [vmem:[#allocation10 + $0x18] sm:$0xff]  ;;  %v445_v35 = vld [vmem:[%s873_s5] ss:$0 sm:$0xff] }
  0x48   :  { %568 = vmatprep.mubr.msk.f32.mxu0 %vm723_vm0, %v722_v0  ;;  %511 = vmatprep.subr.mxu1 %v722_v0  ;;  %v284_v40 = vld [vmem:[#allocation10 + $0x10] sm:$0xff]  ;;  %v283_v41 = vld [vmem:[#allocation10 + $0x8] sm:$0xff]  ;;  %v282_v42 = vld [vmem:[#allocation10] sm:$0xff] }
  0x49   :  { %512 = vmatpush3.msra.mxu1 %v198_v11  ;;  %537 = vmatpush3.msra.mxu0 %v297_v22  ;;  %v447_v43 = vld [vmem:[%s875_s7] ss:$0 sm:$0xff]  ;;  %v101_v52 = vld [vmem:[#allocation5] sm:$0xff] }
  0x4a   :  { %513 = vmatprep.subr.mxu1 %v722_v0  ;;  %538 = vmatprep.subr.mxu0 %v722_v0  ;;  %v448_v48 = vld [vmem:[%s877_s9] ss:$0 sm:$0xff]  ;;  %s724_s9 = smov 32  }
  0x4b   :  { %514 = vmatpush3.msra.mxu1 %v197_v12  ;;  %539 = vmatpush3.msra.mxu0 %v296_v23  ;;  %v449_v53 = vld [vmem:[%s870_s2] ss:$0 sm:$0xff]  ;;  %s725_s2 = smov 96  }
  0x4c   :  { %515 = vmatprep.subr.mxu1 %v722_v0  ;;  %540 = vmatprep.subr.mxu0 %v722_v0  ;;  %v450_v55 = vld [vmem:[%s871_s3] ss:$0 sm:$0xff]  ;;  %s726_s3 = smov [#allocation11]  }
  0x4d   :  { %516 = vmatpush3.msra.mxu1 %v196_v13  ;;  %541 = vmatpush3.msra.mxu0 %v295_v24  ;;  %s434_s23 = sshll.u32 %s726_s3, 4  ;;  %s435_s23 = int_to_ptr.vmem [resolvable:$true] %s434_s23 }
  0x4e   :  { %517 = vmatprep.subr.mxu1 %v722_v0  ;;  %542 = vmatprep.subr.mxu0 %v722_v0  ;;  %s687_s24 = scalar_lea.vmem %s435_s23, 128  ;;  %p692_p12 = scmp.lt.s32.totalorder %s435_s23, %s435_s23 }
  0x4f   :  { %518 = vmatpush3.msra.mxu1 %v195_v14  ;;  %543 = vmatpush3.msra.mxu0 %v294_v25  ;;  %p688_p11 = scmp.ne.s32.totalorder %s435_s23, %s687_s24  ;;  %p693_p13 = scmp.lt.s32.totalorder %s687_s24, %s687_s24 }
  0x50   :  { %519 = vmatprep.subr.mxu1 %v722_v0  ;;  %544 = vmatprep.subr.mxu0 %v722_v0 }
  0x51   :  { %520 = vmatpush3.msra.mxu1 %v194_v15  ;;  %545 = vmatpush3.msra.mxu0 %v293_v26  ;;  %p694_p0 = por %p693_p13, %p692_p12 }
  0x52   :  { %521 = vmatprep.subr.mxu1 %v722_v0  ;;  %546 = vmatprep.subr.mxu0 %v722_v0 }
  0x53   :  { %522 = vmatpush3.msra.mxu1 %v193_v16  ;;  %547 = vmatpush3.msra.mxu0 %v292_v27  ;;  %p695_p1 = pnand %p694_p0, %p688_p11 }
  0x54   :  { %523 = vmatprep.subr.mxu1 %v722_v0  ;;  %548 = vmatprep.subr.mxu0 %v722_v0 }
  0x55   :  { %524 = vmatpush3.msra.mxu1 %v192_v17  ;;  %549 = vmatpush3.msra.mxu0 %v291_v28 }
  0x56   :  { %525 = vmatprep.subr.mxu1 %v722_v0  ;;  %550 = vmatprep.subr.mxu0 %v722_v0 }
  0x57   :  { %526 = vmatpush3.msra.mxu1 %v191_v18  ;;  %551 = vmatpush3.msra.mxu0 %v290_v29 }
  0x58   :  { %527 = vmatprep.subr.mxu1 %v722_v0  ;;  %552 = vmatprep.subr.mxu0 %v722_v0 }
  0x59   :  { %528 = vmatpush3.msra.mxu1 %v190_v19  ;;  %553 = vmatpush3.msra.mxu0 %v289_v30 }
  0x5a   :  { %529 = vmatprep.subr.mxu1 %v722_v0  ;;  %554 = vmatprep.subr.mxu0 %v722_v0 }
  0x5b   :  { %530 = vmatpush3.msra.mxu1 %v189_v20  ;;  %555 = vmatpush3.msra.mxu0 %v288_v31 }
  0x5c   :  { %531 = vmatprep.subr.mxu1 %v722_v0  ;;  %556 = vmatprep.subr.mxu0 %v722_v0 }
  0x5d   :  { %532 = vmatpush3.msra.mxu1 %v188_v21  ;;  %557 = vmatpush3.msra.mxu0 %v287_v32 }
  0x5e   :  { %558 = vmatprep.subr.mxu0 %v722_v0 }
  0x5f   :  { %559 = vmatpush3.msra.mxu0 %v286_v33 }
  0x60   :  { %560 = vmatprep.subr.mxu0 %v722_v0 }
  0x61   :  { %561 = vmatpush3.msra.mxu0 %v285_v34 }
  0x62   :  { %562 = vmatprep.subr.mxu0 %v722_v0 }
  0x63   :  { %563 = vmatpush3.msra.mxu0 %v284_v40 }
  0x64   :  { %564 = vmatprep.subr.mxu0 %v722_v0 }
  0x65   :  { %565 = vmatpush3.msra.mxu0 %v283_v41 }
  0x66   :  { %566 = vmatprep.subr.mxu0 %v722_v0 }
  0x67   :  { %567 = vmatpush3.msra.mxu0 %v282_v42 }
 0x106   :  { %v183_v36 = vpop.f32.mrf.mxu0 }
 0x107   :  { %v184_v37 = vadd.f32 %v445_v35, %v183_v36 }
 0x108   :  { %v500_v38 = vpop.f32.mrf.mxu0 }
 0x109   :  { %v187_v39 = vmax.f32 %v184_v37, 0.0 }
 0x10b   :  { %534 = vmatmul.mubr.f32.vlgmr.msra.gmra.mxu1 %v187_v39 }
 0x1cb   :  { %v277_v44 = vpop.f32.mrf.mxu1 }
 0x1cc   :  { %v278_v45 = vadd.f32 %v447_v43, %v277_v44 }
 0x1cd   :  { %v535_v46 = vpop.f32.mrf.mxu1 }
 0x1ce   :  { %v281_v47 = vmax.f32 %v278_v45, 0.0 }
 0x1d0   :  { %569 = vmatmul.mubr.f32.vlgmr.msra.gmra.mxu0 %v281_v47 }
 0x290   :  { %v371_v49 = vpop.f32.mrf.mxu0 }
 0x291   :  { %v372_v50 = vadd.f32 %v448_v48, %v371_v49 }
 0x292   :  { %v570_v51 = vpop.f32.mrf.mxu0 }
 0x293   :  { %v381_v54 = vmul.f32 2.0, %v372_v50  ;;  %v399_v57 = vsub.f32 %v372_v50, %v101_v52  ;;  %v396_v59 = vmul.f32 %v372_v50, %v372_v50  ;;  %583 = vtanh.f32 %v372_v50 }
 0x295   :  { %v388_v56 = vmul.f32 %v449_v53, %v381_v54  ;;  %v400_v61 = vmul.f32 %v399_v57, %v399_v57 }
 0x297   :  { %v395_v58 = vsub.f32 %v450_v55, %v388_v56 }
 0x299   :  { %v397_v60 = vadd.f32 %v396_v59, %v395_v58 }
 0x29b   :  { %v401_v62 = vsub.f32 %v397_v60, %v400_v61 }
 0x29d   :  { %403 = vrot.lane.b32.xlu0 %v401_v62, %s724_s9 }
 0x2a0   :  { %v584_v63 = vpop.eup %583 }
 0x2a1   :  { %v376_v0 = vsub.f32 0.0, %v584_v63 }
 0x2a3   :  { %v377_v1 = vmul.f32 1.442695, %v376_v0 }
 0x2a5   :  { %585 = vpow2.f32 %v377_v1 }
 0x2b2   :  { %v586_v2 = vpop.eup %585 }
 0x2b3   :  { %v398_v3 = vmul.f32 0.5, %v586_v2 }
 0x30f   :  { %v404_v4 = vpop.permute.xlu0 %403 }
 0x310   :  { %v406_v5 = vmul.f32 %v404_v4, %v398_v3 }
 0x312   :  { %415 = vrot.lane.b32.xlu0 %v406_v5, %s725_s2 }
 0x384   :  { %v416_v6 = vpop.permute.xlu0 %415 }
 0x385   :  { %v418_v7 = vsel %vm113_vm1, %v416_v6, 0.0 }
 0x386   :  { %419 = vadd.xlane.f32.xlu1 %v418_v7 }
 0x40f   :  { %v420_v8 = vpop.xlane.xlu1 %419 }
 0x410   :  { %v421_v9 = vrot.slane %v420_v8, 4 }
 0x412   :  { %v422_v10 = vadd.f32 %v421_v9, %v420_v8 }
 0x414   :  { %v423_v11 = vrot.slane %v422_v10, 2 }
 0x416   :  { %v424_v12 = vadd.f32 %v423_v11, %v422_v10 }
 0x418   :  { %v425_v13 = vrot.slane %v424_v12, 1 }
 0x41a   :  { %v426_v14 = vadd.f32 %v425_v13, %v424_v12 }
 0x41c   :  { %427 = vst [vmem:[#allocation11] sm:$0xff] %v426_v14 }
 0x41d   :  { %698 = shalt.err (!%p695_p1)
}
 0x41e   :  { %437 = dma.vmem_to_hbm [thread:$0]  %s435_s23, 128, %s878_s10, [#allocation4]  }
 0x41f   :  { %713 = dma.done.wait [#allocation4], 128  }
 0x420   :  { %714 = vsyncadd [#allocation4], 4294967168 }
 0x421   :  { %441 = vsyncpa [#allocation3], 1 }
 0x422   :  { %442 = vsyncpa [#allocation6], 1 }
 0x423   :  { %443 = vsyncpa [#allocation9], 1 }
 0x424   :  { %444 = vsyncpa [#allocation4], 1 }

</bundles_post_ra>
